<compile_context>
chip_gen: v6e
topology: v6e:2x2x1
jax: 0.10.0
libtpu: 0.0.40
codegen_flags: <defaults>
</compile_context>

<pallas_src>
import functools
import math

import jax
import jax.numpy as jnp
from jax import lax
from jax.experimental import pallas as pl
from jax.experimental.pallas import tpu as pltpu

_MIB = 1024 * 1024


def _round_up(v, k):
    return -(-v // k) * k


def _vmem_capacity_bytes():
    # Query the chip; fall back to the v7x per-TensorCore capacity (the
    # smallest across v5e/v6e/v7x) so the limit is always physically valid.
    try:
        return int(pltpu.get_tpu_info().vmem_capacity_bytes)
    except Exception:
        return 64 * _MIB


def _make_kernel(act, mm_dtype):
    """Fused: out = act(x @ w1 + b1) @ w2[:, j] + b2[j] for one (TM, TN) tile."""

    def kernel(x_ref, w1_ref, b1_ref, w2_ref, b2_ref, o_ref):
        x = x_ref[...]
        if x.dtype != mm_dtype:
            x = x.astype(mm_dtype)                       # in-kernel cast (VPU)
        # First linear on the MXU, f32 accumulation: (TM, hidden) @ (hidden, L)
        h = jnp.dot(x, w1_ref[...], preferred_element_type=jnp.float32)
        h = h + b1_ref[...]                              # (1, L) f32 broadcast
        if act == "relu":
            h = jnp.maximum(h, 0.0)
        else:
            # Exact erf GELU (matches PyTorch nn.GELU() default); erf hits the
            # EUP slot at the same rate as tanh, so exactness is free.
            h = 0.5 * h * (1.0 + lax.erf(h * (1.0 / math.sqrt(2.0))))
        # Second linear: (TM, L) @ (L, TN), f32 accumulation.
        y = jnp.dot(h.astype(mm_dtype), w2_ref[...],
                    preferred_element_type=jnp.float32)
        y = y + b2_ref[...]
        o_ref[...] = y.astype(o_ref.dtype)

    return kernel


def prepare_dense_synth_params(w1, b1, w2, b2, matmul_dtype=jnp.bfloat16):
    """One-time parameter prep (do at init, NOT per forward call).

    Takes PyTorch nn.Linear layout w1 (L, hidden), w2 (L, L); returns weights
    transposed to (in, out) layout and cast to the MXU matmul dtype, plus f32
    row-vector biases.
    """
    L, hidden = w1.shape
    assert w2.shape == (L, L)
    w1t = jnp.asarray(w1).T.astype(matmul_dtype)         # (hidden, L)
    w2t = jnp.asarray(w2).T.astype(matmul_dtype)         # (L, L)
    b1r = jnp.asarray(b1).reshape(1, L).astype(jnp.float32)
    b2r = jnp.asarray(b2).reshape(1, L).astype(jnp.float32)
    return w1t, b1r, w2t, b2r


def dense_synthesizer_head2(x, w1t, b1r, w2t, b2r, *, act="relu", block_m=1024):
    """JAX/Pallas equivalent of DenseSynthesizerHead2.forward.

    Expects pre-prepared params from prepare_dense_synth_params.
    x may have any leading batch dims; last dim must be hidden_size.
    """
    orig_shape = x.shape
    hidden = orig_shape[-1]
    L = w1t.shape[1]
    assert w1t.shape == (hidden, L)
    assert w2t.shape == (L, L)

    mm_dtype = w1t.dtype
    out_dtype = x.dtype
    x_bytes = jnp.dtype(x.dtype).itemsize
    mm_bytes = jnp.dtype(mm_dtype).itemsize
    out_bytes = jnp.dtype(out_dtype).itemsize

    x2 = x.reshape(-1, hidden)                           # free reshape
    m = x2.shape[0]

    cap = _vmem_capacity_bytes()
    budget = cap - 16 * _MIB                             # headroom for Mosaic

    # ---- output-column tile tn: bound the resident w2 slab (v7x: 64 MiB) ----
    w2_budget = min(budget // 3, 24 * _MIB)
    if L % 128 == 0 and L * L * mm_bytes > w2_budget:
        tn = max(256, (w2_budget // (L * mm_bytes)) // 256 * 256)
        tn = min(tn, L)
    else:
        tn = L
    grid_n = pl.cdiv(L, tn)

    # ---- row tile tm: include the f32 intermediate in the VMEM accounting ----
    resident = (hidden * L + L * tn) * mm_bytes + (L + tn) * 4   # single-buffered
    per_row = (2 * hidden * x_bytes      # x tile, double-buffered
               + 2 * tn * out_bytes      # out tile, double-buffered
               + 2 * L * 4               # f32 h (+ copy around act / cast)
               + tn * 4)                 # f32 MXU result staging
    max_tm = max(8, (budget - resident) // per_row)
    if m <= 8:
        tm = m
    else:
        tm = max(8, min(block_m, _round_up(m, 8), (max_tm // 8) * 8))
        if pl.cdiv(m, tm) < 2:
            # >= 2 row steps so the "parallel" row axis can be sharded across
            # both v7x TensorCores.
            tm = _round_up(pl.cdiv(m, 2), 8)
            if tm >= 256:
                tm = _round_up(tm, 256)  # align to the 256-wide MXU M dim
    grid_m = pl.cdiv(m, tm)

    # VMEM limit: sized from the actual blocks (covering the double-buffered
    # weights fallback) with slack, capped by physical chip capacity.
    needed = 2 * resident + tm * per_row
    vmem_limit = int(min(cap - 8 * _MIB, max(2 * needed, 32 * _MIB)))

    kernel = _make_kernel(act, mm_dtype)

    def _run(single_buffer_weights):
        if single_buffer_weights:
            # Constant-index / slowly-varying blocks do not need double
            # buffering: halves resident-weight VMEM (w2 is the dominant term).
            wspec = functools.partial(pl.BlockSpec, pipeline_mode=pl.Buffered(1))
        else:
            wspec = pl.BlockSpec
        grid_spec = pl.GridSpec(
            # Column tiles outer, row tiles inner: w2 column tile stays put
            # while the (cheap) x row tiles stream underneath it.
            grid=(grid_n, grid_m),
            in_specs=[
                pl.BlockSpec((tm, hidden), lambda j, i: (i, 0)),  # x row tile
                wspec((hidden, L), lambda j, i: (0, 0)),          # w1 resident
                wspec((1, L), lambda j, i: (0, 0)),               # b1 resident
                wspec((L, tn), lambda j, i: (0, j)),              # w2 col tile
                wspec((1, tn), lambda j, i: (0, j)),              # b2 col tile
            ],
            out_specs=pl.BlockSpec((tm, tn), lambda j, i: (i, j)),
        )
        return pl.pallas_call(
            kernel,
            out_shape=jax.ShapeDtypeStruct((m, L), out_dtype),
            grid_spec=grid_spec,
            compiler_params=pltpu.CompilerParams(
                dimension_semantics=("parallel", "parallel"),
                vmem_limit_bytes=vmem_limit,
            ),
            cost_estimate=pl.CostEstimate(
                flops=2 * m * hidden * L * grid_n + 2 * m * L * L,
                transcendentals=0 if act == "relu" else m * L * grid_n,
                bytes_accessed=(m * hidden * x_bytes
                                + (hidden * L + L * L) * mm_bytes
                                + 2 * L * 4
                                + m * L * out_bytes),
            ),
        )(x2, w1t, b1r, w2t, b2r)

    try:
        out2 = _run(True)
    except Exception:
        # Fallback for Pallas versions that reject pipeline_mode=pl.Buffered(1).
        out2 = _run(False)

    # No padding was added, so no slice is needed (partial last row block, if
    # any, is handled by Pallas' masked stores; rows are independent).
    return out2.reshape(orig_shape[:-1] + (L,))


if __name__ == "__main__":
    # Small shapes consistent with the module: batch=2, seq=8, hidden=32,
    # max_length=128 (lane-dense output), act='relu'.
    B, S, hidden_size, max_length = 2, 8, 32, 128

    key = jax.random.PRNGKey(0)
    kx, k1, kb1, k2, kb2 = jax.random.split(key, 5)

    x = jax.random.normal(kx, (B, S, hidden_size), jnp.float32)
    # PyTorch nn.Linear layout: weight is (out_features, in_features).
    w1 = jax.random.normal(k1, (max_length, hidden_size), jnp.float32) * 0.05
    b1 = jax.random.normal(kb1, (max_length,), jnp.float32) * 0.05
    w2 = jax.random.normal(k2, (max_length, max_length), jnp.float32) * 0.05
    b2 = jax.random.normal(kb2, (max_length,), jnp.float32) * 0.05

    # One-time parameter prep (transpose + bf16 cast) -- done at "init".
    params = prepare_dense_synth_params(w1, b1, w2, b2, matmul_dtype=jnp.bfloat16)

    out = dense_synthesizer_head2(x, *params, act="relu")
    out = jax.block_until_ready(out)

    # Pure-JAX f32 reference of the exact PyTorch semantics.
    h_ref = jnp.maximum(jnp.einsum("bsh,lh->bsl", x, w1) + b1, 0.0)
    ref = jnp.einsum("bsl,ml->bsm", h_ref, w2) + b2

    assert out.shape == (B, S, max_length)
    assert out.dtype == x.dtype
    # bf16 MXU matmuls vs f32 reference -> loosened tolerance.
    assert jnp.allclose(out, ref, atol=2e-2, rtol=2e-2), \
        float(jnp.max(jnp.abs(out - ref)))

    print("KERNEL_OK")
</pallas_src>

<mosaic_0001>
module attributes {stable_mosaic.version = 11 : i64} {
  func.func @kernel(%arg0: i32, %arg1: i32, %arg2: memref<8x32xf32, #tpu.memory_space<vmem>>, %arg3: memref<32x128xbf16, #tpu.memory_space<vmem>>, %arg4: memref<1x128xf32, #tpu.memory_space<vmem>>, %arg5: memref<128x128xbf16, #tpu.memory_space<vmem>>, %arg6: memref<1x128xf32, #tpu.memory_space<vmem>>, %arg7: memref<8x128xf32, #tpu.memory_space<vmem>>) attributes {dimension_semantics = [#tpu.dimension_semantics<parallel>, #tpu.dimension_semantics<parallel>], iteration_bounds = array<i64: 1, 2>, scalar_prefetch = 0 : i64, scratch_operands = 0 : i64, tpu.core_type = #tpu.core_type<tc>, window_params = [{transform_indices = @transform_0, window_bounds = array<i64: 8, 32>}, {pipeline_mode = #tpu.pipeline_mode<synchronous>, transform_indices = @transform_1, window_bounds = array<i64: 32, 128>}, {pipeline_mode = #tpu.pipeline_mode<synchronous>, transform_indices = @transform_2, window_bounds = array<i64: 1, 128>}, {pipeline_mode = #tpu.pipeline_mode<synchronous>, transform_indices = @transform_3, window_bounds = array<i64: 128, 128>}, {pipeline_mode = #tpu.pipeline_mode<synchronous>, transform_indices = @transform_4, window_bounds = array<i64: 1, 128>}, {transform_indices = @transform_5, window_bounds = array<i64: 8, 128>}]} {
    %c0 = arith.constant 0 : index
    %c0_0 = arith.constant 0 : index
    %0 = vector.load %arg2[%c0, %c0_0] : memref<8x32xf32, #tpu.memory_space<vmem>>, vector<8x32xf32>
    %1 = arith.truncf %0 : vector<8x32xf32> to vector<8x32xbf16>
    %c0_1 = arith.constant 0 : index
    %c0_2 = arith.constant 0 : index
    %2 = vector.load %arg3[%c0_1, %c0_2] : memref<32x128xbf16, #tpu.memory_space<vmem>>, vector<32x128xbf16>
    %cst = arith.constant dense<0.000000e+00> : vector<8x128xf32>
    %3 = tpu.matmul %1, %2, %cst {dimension_numbers = #tpu.dot_dimension_numbers<[1], [0], [0], [1], [0, 0, 1, 1], [], []>} : vector<8x32xbf16>, vector<32x128xbf16>, vector<8x128xf32> -> vector<8x128xf32>
    %c0_3 = arith.constant 0 : index
    %c0_4 = arith.constant 0 : index
    %4 = vector.load %arg4[%c0_3, %c0_4] : memref<1x128xf32, #tpu.memory_space<vmem>>, vector<1x128xf32>
    %5 = vector.broadcast %4 : vector<1x128xf32> to vector<8x128xf32>
    %6 = arith.addf %3, %5 : vector<8x128xf32>
    %cst_5 = arith.constant 0.000000e+00 : f32
    %7 = vector.broadcast %cst_5 : f32 to vector<8x128xf32>
    %8 = arith.maximumf %6, %7 : vector<8x128xf32>
    %9 = arith.truncf %8 : vector<8x128xf32> to vector<8x128xbf16>
    %c0_6 = arith.constant 0 : index
    %c0_7 = arith.constant 0 : index
    %10 = vector.load %arg5[%c0_6, %c0_7] : memref<128x128xbf16, #tpu.memory_space<vmem>>, vector<128x128xbf16>
    %cst_8 = arith.constant dense<0.000000e+00> : vector<8x128xf32>
    %11 = tpu.matmul %9, %10, %cst_8 {dimension_numbers = #tpu.dot_dimension_numbers<[1], [0], [0], [1], [0, 0, 1, 1], [], []>} : vector<8x128xbf16>, vector<128x128xbf16>, vector<8x128xf32> -> vector<8x128xf32>
    %c0_9 = arith.constant 0 : index
    %c0_10 = arith.constant 0 : index
    %12 = vector.load %arg6[%c0_9, %c0_10] : memref<1x128xf32, #tpu.memory_space<vmem>>, vector<1x128xf32>
    %13 = vector.broadcast %12 : vector<1x128xf32> to vector<8x128xf32>
    %14 = arith.addf %11, %13 : vector<8x128xf32>
    %c0_11 = arith.constant 0 : index
    %c0_12 = arith.constant 0 : index
    %15 = vector.load %arg7[%c0_11, %c0_12] : memref<8x128xf32, #tpu.memory_space<vmem>>, vector<8x128xf32>
    tpu.vector_store %arg7[%c0_11, %c0_12], %14 {strides = array<i32>} : memref<8x128xf32, #tpu.memory_space<vmem>>, vector<8x128xf32>,
    return
  }
  func.func @transform_0(%arg0: i32, %arg1: i32) -> (i32, i32) {
    %c0_i32 = arith.constant 0 : i32
    %c0_i32_0 = arith.constant 0 : i32
    return %arg1, %c0_i32 : i32, i32
  }
  func.func @transform_1(%arg0: i32, %arg1: i32) -> (i32, i32) {
    %c0_i32 = arith.constant 0 : i32
    %c0_i32_0 = arith.constant 0 : i32
    %c0_i32_1 = arith.constant 0 : i32
    return %c0_i32, %c0_i32_0 : i32, i32
  }
  func.func @transform_2(%arg0: i32, %arg1: i32) -> (i32, i32) {
    %c0_i32 = arith.constant 0 : i32
    %c0_i32_0 = arith.constant 0 : i32
    %c0_i32_1 = arith.constant 0 : i32
    return %c0_i32, %c0_i32_0 : i32, i32
  }
  func.func @transform_3(%arg0: i32, %arg1: i32) -> (i32, i32) {
    %c0_i32 = arith.constant 0 : i32
    %c0_i32_0 = arith.constant 0 : i32
    return %c0_i32, %arg0 : i32, i32
  }
  func.func @transform_4(%arg0: i32, %arg1: i32) -> (i32, i32) {
    %c0_i32 = arith.constant 0 : i32
    %c0_i32_0 = arith.constant 0 : i32
    return %c0_i32, %arg0 : i32, i32
  }
  func.func @transform_5(%arg0: i32, %arg1: i32) -> (i32, i32) {
    %c0_i32 = arith.constant 0 : i32
    return %arg1, %arg0 : i32, i32
  }
}

module attributes {stable_mosaic.version = 11 : i64} {
  func.func @kernel(%arg0: i32, %arg1: i32, %arg2: memref<8x32xf32, #tpu.memory_space<vmem>>, %arg3: memref<32x128xbf16, #tpu.memory_space<vmem>>, %arg4: memref<1x128xf32, #tpu.memory_space<vmem>>, %arg5: memref<128x128xbf16, #tpu.memory_space<vmem>>, %arg6: memref<1x128xf32, #tpu.memory_space<vmem>>, %arg7: memref<8x128xf32, #tpu.memory_space<vmem>>) attributes {dimension_semantics = [#tpu.dimension_semantics<parallel>, #tpu.dimension_semantics<parallel>], iteration_bounds = array<i64: 1, 2>, scalar_prefetch = 0 : i64, scratch_operands = 0 : i64, tpu.core_type = #tpu.core_type<tc>, window_params = [{transform_indices = @transform_0, window_bounds = array<i64: 8, 32>}, {pipeline_mode = #tpu.pipeline_mode<synchronous>, transform_indices = @transform_1, window_bounds = array<i64: 32, 128>}, {pipeline_mode = #tpu.pipeline_mode<synchronous>, transform_indices = @transform_2, window_bounds = array<i64: 1, 128>}, {transform_indices = @transform_3, window_bounds = array<i64: 128, 128>}, {transform_indices = @transform_4, window_bounds = array<i64: 1, 128>}, {transform_indices = @transform_5, window_bounds = array<i64: 8, 128>}]} {
    %c0 = arith.constant 0 : index
    %c0_0 = arith.constant 0 : index
    %0 = vector.load %arg2[%c0, %c0_0] : memref<8x32xf32, #tpu.memory_space<vmem>>, vector<8x32xf32>
    %1 = arith.truncf %0 : vector<8x32xf32> to vector<8x32xbf16>
    %c0_1 = arith.constant 0 : index
    %c0_2 = arith.constant 0 : index
    %2 = vector.load %arg3[%c0_1, %c0_2] : memref<32x128xbf16, #tpu.memory_space<vmem>>, vector<32x128xbf16>
    %cst = arith.constant dense<0.000000e+00> : vector<8x128xf32>
    %3 = tpu.matmul %1, %2, %cst {dimension_numbers = #tpu.dot_dimension_numbers<[1], [0], [0], [1], [0, 0, 1, 1], [], []>} : vector<8x32xbf16>, vector<32x128xbf16>, vector<8x128xf32> -> vector<8x128xf32>
    %c0_3 = arith.constant 0 : index
    %c0_4 = arith.constant 0 : index
    %4 = vector.load %arg4[%c0_3, %c0_4] : memref<1x128xf32, #tpu.memory_space<vmem>>, vector<1x128xf32>
    %5 = vector.broadcast %4 : vector<1x128xf32> to vector<8x128xf32>
    %6 = arith.addf %3, %5 : vector<8x128xf32>
    %cst_5 = arith.constant 0.000000e+00 : f32
    %7 = vector.broadcast %cst_5 : f32 to vector<8x128xf32>
    %8 = arith.maximumf %6, %7 : vector<8x128xf32>
    %9 = arith.truncf %8 : vector<8x128xf32> to vector<8x128xbf16>
    %c0_6 = arith.constant 0 : index
    %c0_7 = arith.constant 0 : index
    %10 = vector.load %arg5[%c0_6, %c0_7] : memref<128x128xbf16, #tpu.memory_space<vmem>>, vector<128x128xbf16>
    %cst_8 = arith.constant dense<0.000000e+00> : vector<8x128xf32>
    %11 = tpu.matmul %9, %10, %cst_8 {dimension_numbers = #tpu.dot_dimension_numbers<[1], [0], [0], [1], [0, 0, 1, 1], [], []>} : vector<8x128xbf16>, vector<128x128xbf16>, vector<8x128xf32> -> vector<8x128xf32>
    %c0_9 = arith.constant 0 : index
    %c0_10 = arith.constant 0 : index
    %12 = vector.load %arg6[%c0_9, %c0_10] : memref<1x128xf32, #tpu.memory_space<vmem>>, vector<1x128xf32>
    %13 = vector.broadcast %12 : vector<1x128xf32> to vector<8x128xf32>
    %14 = arith.addf %11, %13 : vector<8x128xf32>
    %c0_11 = arith.constant 0 : index
    %c0_12 = arith.constant 0 : index
    %15 = vector.load %arg7[%c0_11, %c0_12] : memref<8x128xf32, #tpu.memory_space<vmem>>, vector<8x128xf32>
    tpu.vector_store %arg7[%c0_11, %c0_12], %14 {strides = array<i32>} : memref<8x128xf32, #tpu.memory_space<vmem>>, vector<8x128xf32>,
    return
  }
  func.func @transform_0(%arg0: i32, %arg1: i32) -> (i32, i32) {
    %c0_i32 = arith.constant 0 : i32
    %c0_i32_0 = arith.constant 0 : i32
    return %arg1, %c0_i32 : i32, i32
  }
  func.func @transform_1(%arg0: i32, %arg1: i32) -> (i32, i32) {
    %c0_i32 = arith.constant 0 : i32
    %c0_i32_0 = arith.constant 0 : i32
    %c0_i32_1 = arith.constant 0 : i32
    return %c0_i32, %c0_i32_0 : i32, i32
  }
  func.func @transform_2(%arg0: i32, %arg1: i32) -> (i32, i32) {
    %c0_i32 = arith.constant 0 : i32
    %c0_i32_0 = arith.constant 0 : i32
    %c0_i32_1 = arith.constant 0 : i32
    return %c0_i32, %c0_i32_0 : i32, i32
  }
  func.func @transform_3(%arg0: i32, %arg1: i32) -> (i32, i32) {
    %c0_i32 = arith.constant 0 : i32
    %c0_i32_0 = arith.constant 0 : i32
    return %c0_i32, %arg0 : i32, i32
  }
  func.func @transform_4(%arg0: i32, %arg1: i32) -> (i32, i32) {
    %c0_i32 = arith.constant 0 : i32
    %c0_i32_0 = arith.constant 0 : i32
    return %c0_i32, %arg0 : i32, i32
  }
  func.func @transform_5(%arg0: i32, %arg1: i32) -> (i32, i32) {
    %c0_i32 = arith.constant 0 : i32
    return %arg1, %arg0 : i32, i32
  }
}

</mosaic_0001>

<bundles_post_ra>
// kernel: tpu_custom_call.1
= control target key start
LH: loop header
LB: loop body
LE: loop exit
PB: predicated region body
PF: predicated region fallthrough
CT: control target
= control target key end

     0   :  { %s1183_s0 = inlined_call_operand.hbm [shape: f32[16,32], index: 0, kind: input, shape index: {}]   ;;  %s1184_s1 = inlined_call_operand.hbm [shape: bf16[32,128], index: 1, kind: input, shape index: {}]   ;;  %s1185_s2 = inlined_call_operand.vmem [shape: f32[1,128], index: 2, kind: input, shape index: {}]   ;;  %s1186_s3 = inlined_call_operand.hbm [shape: bf16[128,128], index: 3, kind: input, shape index: {}]   ;;  %s1187_s4 = inlined_call_operand.vmem [shape: f32[1,128], index: 4, kind: input, shape index: {}]   ;;  %s1188_s5 = inlined_call_operand.hbm [shape: f32[16,128], index: 5, kind: output, shape index: {}]  }
   0x1   :  { %1192 = sst [smem:[#allocation12_spill]] %s1184_s1 }
   0x2   :  { %10 = vsyncpa [#allocation3], 0 }
   0x3   :  { %12 = vsyncpa [#allocation3 + $0x1], 0 }
   0x4   :  { %13 = vsyncpa [#allocation6], 0 }
   0x5   :  { %14 = vsyncpa [#allocation4], 0 }
   0x6   :  { %16 = vsyncpa [#allocation4 + $0x1], 0  ;;  %s987_s18 = smov 0   ;;  %s989_s19 = smov 0  }
   0x7   :  { %s991_s20 = smov 0   ;;  %s993_s21 = smov 0  }
   0x8   :  { %s995_s22 = smov 0   ;;  %s997_s23 = smov 0  }
   0x9 LB: > { %s615_s24 = sadd.s32 4294967295, %s947_s23   ;;  %s616_s25 = sadd.s32 4294967294, %s947_s23   ;;  %s947_s23 = sphi %s997_s23, %s22_s23   ;;  %s943_s22 = sphi %s995_s22, %s1210_s22   ;;  %s939_s21 = sphi %s993_s21, %s1209_s21   ;;  %s935_s20 = sphi %s991_s20, %s1208_s20   ;;  %s931_s19 = sphi %s989_s19, %s1207_s19   ;;  %s927_s18 = sphi %s987_s18, %s1206_s18  }
   0xa   : > { %p54_p0 = scmp.ne.s32.totalorder %s931_s19, %s927_s18  ;;  %p1021_p1 = scmp.eq.s32.totalorder %s615_s24, 0 }
   0xb   : > { %p1025_p2 = scmp.eq.s32.totalorder %s615_s24, 1  ;;  %p180_p3 = scmp.eq.s32.totalorder %s616_s25, 1 }
   0xc   : > { %s1193_s26 = scalar_select %p1021_p1, 1, 0 }
   0xd   : > { %p1031_p4 = por %p1021_p1, %p54_p0  ;;  %p617_p5 = scmp.ge.s32.totalorder %s947_s23, 1 }
   0xe   : > { %p1036_p6 = por %p180_p3, %p54_p0  ;;  %p187_p7 = scmp.lt.s32.totalorder %s947_s23, 3 }
   0xf   : > { %s1195_s28 = scalar_select %p1031_p4, 1, 0 }
  0x10   : > { %s1196_s29 = scalar_select %p1036_p6, 1, 0 }
  0x11   : > { %p1041_p8 = pnand %p617_p5, %p187_p7  ;;  %s949_s6 = smov [#allocation5]  }
  0x12   : > { %s199_s7 = sshll.u32 %s949_s6, 4  ;;  %s950_s9 = smov [#allocation7]   ;;  %s200_s7 = int_to_ptr.vmem [resolvable:$true] %s199_s7 }
  0x13   : > { %p698_p9 = pneg %p1041_p8  ;;  %s217_s10 = sshll.u32 %s950_s9, 4  ;;  %s218_s10 = int_to_ptr.vmem [resolvable:$true] %s217_s10 }
  0x14   : > { %s794_s11 = scalar_lea.vmem %s200_s7, 256  ;;  %p802_p5 = scmp.lt.s32.totalorder %s200_s7, %s200_s7 }
  0x15   : > { %p1050_p11 = pnand %p698_p9, %p1021_p1  ;;  %p795_p13 = scmp.ne.s32.totalorder %s200_s7, %s794_s11 }
  0x16   : > { %p803_p7 = scmp.lt.s32.totalorder %s794_s11, %s794_s11 }
  0x17   : > { %p785_p12 = pneg %p1050_p11 }
  0x18   : > { %p804_p10 = por %p803_p7, %p802_p5 }
  0x19   : > { %p797_p0 = pnand %p795_p13, %p785_p12 }
  0x1b   : > { %p798_p3 = pneg %p797_p0 }
  0x1d   : > { %p805_p9 = pnand %p804_p10, %p798_p3 }
  0x1f   : > { %808 = shalt.err (!%p805_p9)
}
  0x20   : > { %s951_s12 = smov 64   ;;  %s952_s13 = smov 4  }
  0x21   : > { %s1199_s1 = sld [smem:[#allocation12_spill]]  ;;  %s820_s16 = scalar_lea.vmem %s218_s10, 1024 }
  0x22   : > { %p821_p6 = scmp.ne.s32.totalorder %s218_s10, %s820_s16  ;;  %p828_p1 = scmp.lt.s32.totalorder %s218_s10, %s218_s10 }
  0x23   : > { %p829_p4 = scmp.lt.s32.totalorder %s820_s16, %s820_s16 }
  0x24   : > { %p823_p13 = pnand %p821_p6, %p785_p12 }
  0x25   : > { %p830_p5 = por %p829_p4, %p828_p1 }
  0x26   : > { %p824_p0 = pneg %p823_p13 }
  0x27   : > { %701 = dma.hbm_to_vmem [thread:$0]  (!%p1050_p11), %s1199_s1, 256, %s200_s7, [#allocation6], %s951_s12, %s951_s12, %s952_s13  }
  0x28   : > { %p831_p10 = pnand %p830_p5, %p824_p0 }
  0x2a   : > { %834 = shalt.err (!%p831_p10)
}
  0x2b   : > { %704 = dma.hbm_to_vmem [thread:$0]  (!%p1050_p11), %s1186_s3, 1024, %s218_s10, [#allocation6], %s951_s12, %s951_s12, %s952_s13  }
  0x2c   : > { %s31_s25 = sadd.s32 1, %s943_s22  ;;  %s41_s6 = sadd.s32 1, %s935_s20 }
  0x2d   : > { %p32_p1 = scmp.ge.s32.totalorder %s31_s25, 2  ;;  %p48_p4 = scmp.ne.s32.totalorder %s935_s20, %s931_s19 }
  0x2e   : > { %p49_p6 = scmp.eq.s32.totalorder %s947_s23, 0  ;;  %p715_p12 = scmp.lt.s32.totalorder %s947_s23, 2 }
  0x2f   : > { %s1212_s25 = smov (%p32_p1, %s31_s25), 0  ;;  %p1082_p7 = por %p1025_p2, %p48_p4 }
  0x30   : > { %p50_p3 = por %p49_p6, %p48_p4  ;;  %s38_s8 = ssub.s32 %s943_s22, %s1212_s25 }
  0x31   : > { %s237_s9 = sand.u32 1, %s935_s20   ;;  %p39_p9 = scmp.eq.s32.totalorder %s38_s8, 0 }
  0x32   : > { %s622_s10 = sshll.u32 %s237_s9, 3  ;;  %s623_s11 = sshll.u32 %s943_s22, 7 }
  0x33   : > { %s1091_s12 = scalar_select %p39_p9, %s935_s20, %s41_s6  }
  0x34   : > { %s246_s15 = scalar_lea.hbm %s1183_s0, %s623_s11  ;;  %s241_s16 = scalar_lea.vmem [#allocation2], %s622_s10 }
  0x35   : > { %s248_s17 = sshll.u32 %s241_s16, 4  ;;  %p1098_p11 = pnand %p715_p12, %p50_p3  ;;  %s249_s17 = int_to_ptr.vmem [resolvable:$true] %s248_s17 }
  0x36   : > { %s238_s24 = scalar_lea.sflag [#allocation3], %s237_s9  ;;  %s848_s8 = scalar_lea.vmem %s249_s17, 128 }
  0x37   : > { %p837_p2 = pneg %p1098_p11  ;;  %p849_p13 = scmp.ne.s32.totalorder %s249_s17, %s848_s8 }
  0x38   : > { %s953_s6 = smov [#allocation2]  }
  0x39   : > { %p851_p0 = pnand %p849_p13, %p837_p2  ;;  %s853_s1 = sshll.u32 %s953_s6, 4  ;;  %s854_s1 = int_to_ptr.vmem [resolvable:$false] %s853_s1 }
  0x3a   : > { %s855_s11 = scalar_lea.vmem %s854_s1, 256  ;;  %p856_p10 = scmp.lt.s32.totalorder %s249_s17, %s854_s1 }
  0x3b   : > { %p852_p5 = pneg %p851_p0  ;;  %p857_p1 = scmp.lt.s32.totalorder %s855_s11, %s848_s8 }
  0x3d   : > { %p858_p4 = por %p857_p1, %p856_p10 }
  0x3f   : > { %p859_p6 = pnand %p858_p4, %p852_p5 }
  0x41   : > { %862 = shalt.err (!%p859_p6)
}
  0x42   : > { %708 = dma.hbm_to_vmem [thread:$0]  (!%p1098_p11), %s246_s15, 128, %s249_s17, %s238_s24  }
  0x43   : > { %257 = sbr.rel (%p1041_p8) target bundleno = 494 (0x1ee), region = 40  ;;  %s1109_s9 = sand.u32 (!%p1041_p8), 1, %s931_s19  }
  0x44   : > { %s625_s10 = sshll.u32 (!%p1041_p8), %s1109_s9, 3  ;;  %s260_s13 = scalar_lea.sflag (!%p1041_p8), [#allocation3], %s1109_s9 }
  0x45   : > { %s263_s1 = scalar_lea.vmem (!%p1041_p8), [#allocation2], %s625_s10  ;;  %p1202_p12 = scmp.ne.s32.totalorder (!%p1041_p8), %s1195_s28, 0 }
  0x48   : > { %914 = dma.done.wait (%p1202_p12), %s260_s13, 128  }
  0x49   : > { %916 = vsyncadd (%p1202_p12), %s260_s13, 4294967168  ;;  %p1203_p3 = scmp.ne.s32.totalorder %s1193_s26, 0 }
  0x4b   : > { %918 = dma.done.wait (%p1203_p3), [#allocation6], 1280  }
  0x4c   : > { %920 = vsyncadd (%p1203_p3), [#allocation6], 4294966016  ;;  %v954_v0 = vmov 0.0   ;;  %vm955_vm0 = vmmov 0   ;;  %v773_v1 = vld [vmem:[#allocation5 + $0x8] sm:$0xff]   ;;  %v774_v2 = vld [vmem:[#allocation5] sm:$0xff]  }
  0x4d   : > { %658 = vmatprep.subr.bf16.mxu0 %v954_v0  ;;  %662 = vmatprep.mubr.msk.bf16.mxu0 %vm955_vm0, %v954_v0  ;;  %v305_v3 = vld [vmem:[%s263_s1] sm:$0xff]  ;;  %v775_v4 = vld [vmem:[#allocation7 + $0x38] sm:$0xff]   ;;  %v776_v6 = vld [vmem:[#allocation7 + $0x30] sm:$0xff]   ;;  %vm330_vm1 = vcmask 261120   ;;  %s643_s15 = sshll.u32 %s939_s21, 7  ;;  %s300_s16 = scalar_lea.vmem [#allocation8], %s625_s10 }
  0x4e   : > { %666 = vmatprep.subr.bf16.mxu1 %v954_v0  ;;  %682 = vmatprep.mubr.msk.bf16.mxu1 %vm955_vm0, %v954_v0  ;;  %v306_v5 = vpack.c.bf16 %v305_v3, %v305_v3  ;;  %v777_v7 = vld [vmem:[#allocation7 + $0x28] sm:$0xff]   ;;  %v778_v8 = vld [vmem:[#allocation7 + $0x20] sm:$0xff]   ;;  %v779_v9 = vld [vmem:[#allocation7 + $0x18] sm:$0xff]   ;;  %s503_s17 = sshll.u32 %s300_s16, 4  ;;  %s1135_s8 = scalar_lea.hbm %s1188_s5, %s643_s15  ;;  %s1137_s17 = int_to_ptr.vmem [resolvable:$true] %s503_s17 }
  0x4f   : > { %659 = vmatpush3.bf16.msra.mxu0 %v773_v1  ;;  %667 = vmatpush3.bf16.msra.mxu1 %v775_v4  ;;  %v780_v10 = vld [vmem:[#allocation7 + $0x10] sm:$0xff]   ;;  %v781_v11 = vld [vmem:[#allocation7 + $0x8] sm:$0xff]   ;;  %v782_v12 = vld [vmem:[#allocation7] sm:$0xff]   ;;  %s489_s6 = scalar_lea.sflag [#allocation4], %s1109_s9  ;;  %s863_s21 = scalar_lea.vmem %s1137_s17, 128 }
  0x50   : > { %660 = vmatprep.subr.bf16.mxu0 %v954_v0  ;;  %668 = vmatprep.subr.bf16.mxu1 %v954_v0  ;;  %v629_v13 = vld [vmem:[%s1185_s2] ss:$0 sm:$0xff]  ;;  %p864_p8 = scmp.ne.s32.totalorder %s1137_s17, %s863_s21  ;;  %s956_s11 = smov [#allocation8]  }
  0x51   : > { %v633_v21 = vld [vmem:[%s1187_s4] ss:$0 sm:$0xff]  ;;  %s867_s10 = sshll.u32 %s956_s11, 4  ;;  %s868_s10 = int_to_ptr.vmem [resolvable:$false] %s867_s10 }
  0x52   : > { %p865_p9 = pnand %p864_p8, %p1082_p7  ;;  %s869_s13 = scalar_lea.vmem %s868_s10, 256 }
  0x53   : > { %661 = vmatpush3.bf16.msra.mxu0 %v774_v2  ;;  %669 = vmatpush3.bf16.msra.mxu1 %v776_v6  ;;  %p870_p2 = scmp.lt.s32.totalorder %s1137_s17, %s868_s10  ;;  %p871_p13 = scmp.lt.s32.totalorder %s869_s13, %s863_s21 }
  0x54   : > { %670 = vmatprep.subr.bf16.mxu1 %v954_v0  ;;  %p866_p11 = pneg %p865_p9 }
  0x55   : > { %p872_p0 = por %p871_p13, %p870_p2 }
  0x56   : > { %663 = vmatmul.mubr.msk.bf16.vlgmr.msra.gmra.mxu0 %vm330_vm1, %v306_v5 }
  0x57   : > { %671 = vmatpush3.bf16.msra.mxu1 %v777_v7  ;;  %p873_p5 = pnand %p872_p0, %p866_p11 }
  0x58   : > { %672 = vmatprep.subr.bf16.mxu1 %v954_v0 }
  0x5b   : > { %673 = vmatpush3.bf16.msra.mxu1 %v778_v8 }
  0x5c   : > { %674 = vmatprep.subr.bf16.mxu1 %v954_v0 }
  0x5f   : > { %675 = vmatpush3.bf16.msra.mxu1 %v779_v9 }
  0x60   : > { %676 = vmatprep.subr.bf16.mxu1 %v954_v0 }
  0x63   : > { %677 = vmatpush3.bf16.msra.mxu1 %v780_v10 }
  0x64   : > { %678 = vmatprep.subr.bf16.mxu1 %v954_v0 }
  0x67   : > { %679 = vmatpush3.bf16.msra.mxu1 %v781_v11 }
  0x68   : > { %680 = vmatprep.subr.bf16.mxu1 %v954_v0 }
  0x6b   : > { %681 = vmatpush3.bf16.msra.mxu1 %v782_v12 }
 0x116   : > { %v368_v14 = vpop.f32.mrf.mxu0 }
 0x117   : > { %v369_v15 = vadd.f32 %v629_v13, %v368_v14 }
 0x118   : > { %v664_v16 = vpop.f32.mrf.mxu0 }
 0x119   : > { %v374_v17 = vmax.f32 %v369_v15, 0.0 }
 0x11a   : > { %v371_v18 = vpop.f32.mrf.mxu0 }
 0x11b   : > { %v375_v19 = vpack.c.bf16 %v374_v17, %v374_v17 }
 0x11c   : > { %v665_v20 = vpop.f32.mrf.mxu0 }
 0x11d   : > { %683 = vmatmul.mubr.bf16.vlgmr.msra.gmra.mxu1 %v375_v19 }
 0x1dd   : > { %v481_v22 = vpop.f32.mrf.mxu1 }
 0x1de   : > { %v482_v23 = vadd.f32 %v633_v21, %v481_v22 }
 0x1df   : > { %v684_v24 = vpop.f32.mrf.mxu1 }
 0x1e0   : > { %487 = vst [vmem:[%s300_s16] sm:$0xff] %v482_v23 }
 0x1e1   : > { %v484_v25 = vpop.f32.mrf.mxu1 }
 0x1e2   : > { %876 = shalt.err (!%p873_p5)
}
 0x1e3   : > { %s877_s1 = scalar_lea.hbm %s1135_s8, 128  ;;  %s881_s28 = scalar_lea.hbm %s1188_s5, 256 }
 0x1e4   : > { %p878_p10 = scmp.ne.s32.totalorder %s1135_s8, %s877_s1  ;;  %p882_p6 = scmp.lt.s32.totalorder %s1135_s8, %s1188_s5 }
 0x1e5   : > { %p883_p12 = scmp.lt.s32.totalorder %s881_s28, %s877_s1 }
 0x1e6   : > { %p879_p1 = pnand %p878_p10, %p1082_p7 }
 0x1e7   : > { %p884_p3 = por %p883_p12, %p882_p6 }
 0x1e8   : > { %p880_p4 = pneg %p879_p1 }
 0x1ea   : > { %p885_p8 = pnand %p884_p3, %p880_p4 }
 0x1ec   : > { %888 = shalt.err (!%p885_p8)
}
 0x1ed   : > { %696 = dma.vmem_to_hbm [thread:$0]  (%p1082_p7), %s1137_s17, 128, %s1135_s8, %s489_s6   ;;  %v685_v26 = vpop.f32.mrf.mxu1 }
 0x1ee PF: > { %s515_s15 = sand.u32 1, %s927_s18   ;;  %p1204_p9 = scmp.ne.s32.totalorder %s1196_s29, 0 }
 0x1ef   : > { %p1205_p11 = scmp.ge.s32.totalorder %s947_s23, 2  ;;  %s516_s16 = scalar_lea.sflag [#allocation4], %s515_s15 }
 0x1f1   : > { %p710_p2 = pnand %p1205_p11, %p1204_p9 }
 0x1f3   : > { %p711_p13 = pneg %p710_p2 }
 0x1f5   : > { %922 = dma.done.wait (%p711_p13), %s516_s16, 128  }
 0x1f6   : > { %924 = vsyncadd (%p711_p13), %s516_s16, 4294967168  ;;  %s22_s23 = sadd.s32 1, %s947_s23   ;;  %s1206_s18 = smov %s931_s19 }
 0x1f7   : > { %p19_p0 = scmp.ge.s32.totalorder %s22_s23, 4   ;;  %s1207_s19 = smov %s935_s20 }
 0x1f8   : > { %s1208_s20 = smov %s1091_s12  ;;  %s1209_s21 = smov %s943_s22 }
 0x1f9   : > { %s1210_s22 = smov %s1212_s25  ;;  %21 = sbr.rel (!%p19_p0) target bundleno = 9 (0x9), region = 97 }
 0x1fe   :  { %521 = vsyncpa [#allocation3], 1 }
 0x1ff   :  { %523 = vsyncpa [#allocation3 + $0x1], 1 }
 0x200   :  { %524 = vsyncpa [#allocation6], 1 }
 0x201   :  { %525 = vsyncpa [#allocation4], 1 }
 0x202   :  { %527 = vsyncpa [#allocation4 + $0x1], 1 }

// kernel: tpu_custom_call.1
= control target key start
LH: loop header
LB: loop body
LE: loop exit
PB: predicated region body
PF: predicated region fallthrough
CT: control target
= control target key end

     0   :  { %s1183_s0 = inlined_call_operand.hbm [shape: f32[16,32], index: 0, kind: input, shape index: {}]   ;;  %s1184_s1 = inlined_call_operand.hbm [shape: bf16[32,128], index: 1, kind: input, shape index: {}]   ;;  %s1185_s2 = inlined_call_operand.vmem [shape: f32[1,128], index: 2, kind: input, shape index: {}]   ;;  %s1186_s3 = inlined_call_operand.hbm [shape: bf16[128,128], index: 3, kind: input, shape index: {}]   ;;  %s1187_s4 = inlined_call_operand.vmem [shape: f32[1,128], index: 4, kind: input, shape index: {}]   ;;  %s1188_s5 = inlined_call_operand.hbm [shape: f32[16,128], index: 5, kind: output, shape index: {}]  }
   0x1   :  { %1192 = sst [smem:[#allocation12_spill]] %s1184_s1 }
   0x2   :  { %10 = vsyncpa [#allocation3], 0 }
   0x3   :  { %12 = vsyncpa [#allocation3 + $0x1], 0 }
   0x4   :  { %13 = vsyncpa [#allocation6], 0 }
   0x5   :  { %14 = vsyncpa [#allocation4], 0 }
   0x6   :  { %16 = vsyncpa [#allocation4 + $0x1], 0  ;;  %s987_s18 = smov 0   ;;  %s989_s19 = smov 0  }
   0x7   :  { %s991_s20 = smov 0   ;;  %s993_s21 = smov 0  }
   0x8   :  { %s995_s22 = smov 0   ;;  %s997_s23 = smov 0  }
   0x9 LB: > { %s615_s24 = sadd.s32 4294967295, %s947_s23   ;;  %s616_s25 = sadd.s32 4294967294, %s947_s23   ;;  %s947_s23 = sphi %s997_s23, %s22_s23   ;;  %s943_s22 = sphi %s995_s22, %s1210_s22   ;;  %s939_s21 = sphi %s993_s21, %s1209_s21   ;;  %s935_s20 = sphi %s991_s20, %s1208_s20   ;;  %s931_s19 = sphi %s989_s19, %s1207_s19   ;;  %s927_s18 = sphi %s987_s18, %s1206_s18  }
   0xa   : > { %p54_p0 = scmp.ne.s32.totalorder %s931_s19, %s927_s18  ;;  %p1021_p1 = scmp.eq.s32.totalorder %s615_s24, 0 }
   0xb   : > { %p1025_p2 = scmp.eq.s32.totalorder %s615_s24, 1  ;;  %p180_p3 = scmp.eq.s32.totalorder %s616_s25, 1 }
   0xc   : > { %s1193_s26 = scalar_select %p1021_p1, 1, 0 }
   0xd   : > { %p1031_p4 = por %p1021_p1, %p54_p0  ;;  %p617_p5 = scmp.ge.s32.totalorder %s947_s23, 1 }
   0xe   : > { %p1036_p6 = por %p180_p3, %p54_p0  ;;  %p187_p7 = scmp.lt.s32.totalorder %s947_s23, 3 }
   0xf   : > { %s1195_s28 = scalar_select %p1031_p4, 1, 0 }
  0x10   : > { %s1196_s29 = scalar_select %p1036_p6, 1, 0 }
  0x11   : > { %p1041_p8 = pnand %p617_p5, %p187_p7  ;;  %s949_s6 = smov [#allocation5]  }
  0x12   : > { %s199_s7 = sshll.u32 %s949_s6, 4  ;;  %s950_s9 = smov [#allocation7]   ;;  %s200_s7 = int_to_ptr.vmem [resolvable:$true] %s199_s7 }
  0x13   : > { %p698_p9 = pneg %p1041_p8  ;;  %s217_s10 = sshll.u32 %s950_s9, 4  ;;  %s218_s10 = int_to_ptr.vmem [resolvable:$true] %s217_s10 }
  0x14   : > { %s794_s11 = scalar_lea.vmem %s200_s7, 256  ;;  %p802_p5 = scmp.lt.s32.totalorder %s200_s7, %s200_s7 }
  0x15   : > { %p1050_p11 = pnand %p698_p9, %p1021_p1  ;;  %p795_p13 = scmp.ne.s32.totalorder %s200_s7, %s794_s11 }
  0x16   : > { %p803_p7 = scmp.lt.s32.totalorder %s794_s11, %s794_s11 }
  0x17   : > { %p785_p12 = pneg %p1050_p11 }
  0x18   : > { %p804_p10 = por %p803_p7, %p802_p5 }
  0x19   : > { %p797_p0 = pnand %p795_p13, %p785_p12 }
  0x1b   : > { %p798_p3 = pneg %p797_p0 }
  0x1d   : > { %p805_p9 = pnand %p804_p10, %p798_p3 }
  0x1f   : > { %808 = shalt.err (!%p805_p9)
}
  0x20   : > { %s951_s12 = smov 64   ;;  %s952_s13 = smov 4  }
  0x21   : > { %s1199_s1 = sld [smem:[#allocation12_spill]]  ;;  %s820_s16 = scalar_lea.vmem %s218_s10, 1024 }
  0x22   : > { %p821_p6 = scmp.ne.s32.totalorder %s218_s10, %s820_s16  ;;  %p828_p1 = scmp.lt.s32.totalorder %s218_s10, %s218_s10 }
  0x23   : > { %p829_p4 = scmp.lt.s32.totalorder %s820_s16, %s820_s16 }
  0x24   : > { %p823_p13 = pnand %p821_p6, %p785_p12 }
  0x25   : > { %p830_p5 = por %p829_p4, %p828_p1 }
  0x26   : > { %p824_p0 = pneg %p823_p13 }
  0x27   : > { %701 = dma.hbm_to_vmem [thread:$0]  (!%p1050_p11), %s1199_s1, 256, %s200_s7, [#allocation6], %s951_s12, %s951_s12, %s952_s13  }
  0x28   : > { %p831_p10 = pnand %p830_p5, %p824_p0 }
  0x2a   : > { %834 = shalt.err (!%p831_p10)
}
  0x2b   : > { %704 = dma.hbm_to_vmem [thread:$0]  (!%p1050_p11), %s1186_s3, 1024, %s218_s10, [#allocation6], %s951_s12, %s951_s12, %s952_s13  }
  0x2c   : > { %s31_s25 = sadd.s32 1, %s943_s22  ;;  %s41_s6 = sadd.s32 1, %s935_s20 }
  0x2d   : > { %p32_p1 = scmp.ge.s32.totalorder %s31_s25, 2  ;;  %p48_p4 = scmp.ne.s32.totalorder %s935_s20, %s931_s19 }
  0x2e   : > { %p49_p6 = scmp.eq.s32.totalorder %s947_s23, 0  ;;  %p715_p12 = scmp.lt.s32.totalorder %s947_s23, 2 }
  0x2f   : > { %s1212_s25 = smov (%p32_p1, %s31_s25), 0  ;;  %p1082_p7 = por %p1025_p2, %p48_p4 }
  0x30   : > { %p50_p3 = por %p49_p6, %p48_p4  ;;  %s38_s8 = ssub.s32 %s943_s22, %s1212_s25 }
  0x31   : > { %s237_s9 = sand.u32 1, %s935_s20   ;;  %p39_p9 = scmp.eq.s32.totalorder %s38_s8, 0 }
  0x32   : > { %s622_s10 = sshll.u32 %s237_s9, 3  ;;  %s623_s11 = sshll.u32 %s943_s22, 7 }
  0x33   : > { %s1091_s12 = scalar_select %p39_p9, %s935_s20, %s41_s6  }
  0x34   : > { %s246_s15 = scalar_lea.hbm %s1183_s0, %s623_s11  ;;  %s241_s16 = scalar_lea.vmem [#allocation2], %s622_s10 }
  0x35   : > { %s248_s17 = sshll.u32 %s241_s16, 4  ;;  %p1098_p11 = pnand %p715_p12, %p50_p3  ;;  %s249_s17 = int_to_ptr.vmem [resolvable:$true] %s248_s17 }
  0x36   : > { %s238_s24 = scalar_lea.sflag [#allocation3], %s237_s9  ;;  %s848_s8 = scalar_lea.vmem %s249_s17, 128 }
  0x37   : > { %p837_p2 = pneg %p1098_p11  ;;  %p849_p13 = scmp.ne.s32.totalorder %s249_s17, %s848_s8 }
  0x38   : > { %s953_s6 = smov [#allocation2]  }
  0x39   : > { %p851_p0 = pnand %p849_p13, %p837_p2  ;;  %s853_s1 = sshll.u32 %s953_s6, 4  ;;  %s854_s1 = int_to_ptr.vmem [resolvable:$false] %s853_s1 }
  0x3a   : > { %s855_s11 = scalar_lea.vmem %s854_s1, 256  ;;  %p856_p10 = scmp.lt.s32.totalorder %s249_s17, %s854_s1 }
  0x3b   : > { %p852_p5 = pneg %p851_p0  ;;  %p857_p1 = scmp.lt.s32.totalorder %s855_s11, %s848_s8 }
  0x3d   : > { %p858_p4 = por %p857_p1, %p856_p10 }
  0x3f   : > { %p859_p6 = pnand %p858_p4, %p852_p5 }
  0x41   : > { %862 = shalt.err (!%p859_p6)
}
  0x42   : > { %708 = dma.hbm_to_vmem [thread:$0]  (!%p1098_p11), %s246_s15, 128, %s249_s17, %s238_s24  }
  0x43   : > { %257 = sbr.rel (%p1041_p8) target bundleno = 494 (0x1ee), region = 40  ;;  %s1109_s9 = sand.u32 (!%p1041_p8), 1, %s931_s19  }
  0x44   : > { %s625_s10 = sshll.u32 (!%p1041_p8), %s1109_s9, 3  ;;  %s260_s13 = scalar_lea.sflag (!%p1041_p8), [#allocation3], %s1109_s9 }
  0x45   : > { %s263_s1 = scalar_lea.vmem (!%p1041_p8), [#allocation2], %s625_s10  ;;  %p1202_p12 = scmp.ne.s32.totalorder (!%p1041_p8), %s1195_s28, 0 }
  0x48   : > { %914 = dma.done.wait (%p1202_p12), %s260_s13, 128  }
  0x49   : > { %916 = vsyncadd (%p1202_p12), %s260_s13, 4294967168  ;;  %p1203_p3 = scmp.ne.s32.totalorder %s1193_s26, 0 }
  0x4b   : > { %918 = dma.done.wait (%p1203_p3), [#allocation6], 1280  }
  0x4c   : > { %920 = vsyncadd (%p1203_p3), [#allocation6], 4294966016  ;;  %v954_v0 = vmov 0.0   ;;  %vm955_vm0 = vmmov 0   ;;  %v773_v1 = vld [vmem:[#allocation5 + $0x8] sm:$0xff]   ;;  %v774_v2 = vld [vmem:[#allocation5] sm:$0xff]  }
  0x4d   : > { %658 = vmatprep.subr.bf16.mxu0 %v954_v0  ;;  %662 = vmatprep.mubr.msk.bf16.mxu0 %vm955_vm0, %v954_v0  ;;  %v305_v3 = vld [vmem:[%s263_s1] sm:$0xff]  ;;  %v775_v4 = vld [vmem:[#allocation7 + $0x38] sm:$0xff]   ;;  %v776_v6 = vld [vmem:[#allocation7 + $0x30] sm:$0xff]   ;;  %vm330_vm1 = vcmask 261120   ;;  %s643_s15 = sshll.u32 %s939_s21, 7  ;;  %s300_s16 = scalar_lea.vmem [#allocation8], %s625_s10 }
  0x4e   : > { %666 = vmatprep.subr.bf16.mxu1 %v954_v0  ;;  %682 = vmatprep.mubr.msk.bf16.mxu1 %vm955_vm0, %v954_v0  ;;  %v306_v5 = vpack.c.bf16 %v305_v3, %v305_v3  ;;  %v777_v7 = vld [vmem:[#allocation7 + $0x28] sm:$0xff]   ;;  %v778_v8 = vld [vmem:[#allocation7 + $0x20] sm:$0xff]   ;;  %v779_v9 = vld [vmem:[#allocation7 + $0x18] sm:$0xff]   ;;  %s503_s17 = sshll.u32 %s300_s16, 4  ;;  %s1135_s8 = scalar_lea.hbm %s1188_s5, %s643_s15  ;;  %s1137_s17 = int_to_ptr.vmem [resolvable:$true] %s503_s17 }
  0x4f   : > { %659 = vmatpush3.bf16.msra.mxu0 %v773_v1  ;;  %667 = vmatpush3.bf16.msra.mxu1 %v775_v4  ;;  %v780_v10 = vld [vmem:[#allocation7 + $0x10] sm:$0xff]   ;;  %v781_v11 = vld [vmem:[#allocation7 + $0x8] sm:$0xff]   ;;  %v782_v12 = vld [vmem:[#allocation7] sm:$0xff]   ;;  %s489_s6 = scalar_lea.sflag [#allocation4], %s1109_s9  ;;  %s863_s21 = scalar_lea.vmem %s1137_s17, 128 }
  0x50   : > { %660 = vmatprep.subr.bf16.mxu0 %v954_v0  ;;  %668 = vmatprep.subr.bf16.mxu1 %v954_v0  ;;  %v629_v13 = vld [vmem:[%s1185_s2] ss:$0 sm:$0xff]  ;;  %p864_p8 = scmp.ne.s32.totalorder %s1137_s17, %s863_s21  ;;  %s956_s11 = smov [#allocation8]  }
  0x51   : > { %v633_v21 = vld [vmem:[%s1187_s4] ss:$0 sm:$0xff]  ;;  %s867_s10 = sshll.u32 %s956_s11, 4  ;;  %s868_s10 = int_to_ptr.vmem [resolvable:$false] %s867_s10 }
  0x52   : > { %p865_p9 = pnand %p864_p8, %p1082_p7  ;;  %s869_s13 = scalar_lea.vmem %s868_s10, 256 }
  0x53   : > { %661 = vmatpush3.bf16.msra.mxu0 %v774_v2  ;;  %669 = vmatpush3.bf16.msra.mxu1 %v776_v6  ;;  %p870_p2 = scmp.lt.s32.totalorder %s1137_s17, %s868_s10  ;;  %p871_p13 = scmp.lt.s32.totalorder %s869_s13, %s863_s21 }
  0x54   : > { %670 = vmatprep.subr.bf16.mxu1 %v954_v0  ;;  %p866_p11 = pneg %p865_p9 }
  0x55   : > { %p872_p0 = por %p871_p13, %p870_p2 }
  0x56   : > { %663 = vmatmul.mubr.msk.bf16.vlgmr.msra.gmra.mxu0 %vm330_vm1, %v306_v5 }
  0x57   : > { %671 = vmatpush3.bf16.msra.mxu1 %v777_v7  ;;  %p873_p5 = pnand %p872_p0, %p866_p11 }
  0x58   : > { %672 = vmatprep.subr.bf16.mxu1 %v954_v0 }
  0x5b   : > { %673 = vmatpush3.bf16.msra.mxu1 %v778_v8 }
  0x5c   : > { %674 = vmatprep.subr.bf16.mxu1 %v954_v0 }
  0x5f   : > { %675 = vmatpush3.bf16.msra.mxu1 %v779_v9 }
  0x60   : > { %676 = vmatprep.subr.bf16.mxu1 %v954_v0 }
  0x63   : > { %677 = vmatpush3.bf16.msra.mxu1 %v780_v10 }
  0x64   : > { %678 = vmatprep.subr.bf16.mxu1 %v954_v0 }
  0x67   : > { %679 = vmatpush3.bf16.msra.mxu1 %v781_v11 }
  0x68   : > { %680 = vmatprep.subr.bf16.mxu1 %v954_v0 }
  0x6b   : > { %681 = vmatpush3.bf16.msra.mxu1 %v782_v12 }
 0x116   : > { %v368_v14 = vpop.f32.mrf.mxu0 }
 0x117   : > { %v369_v15 = vadd.f32 %v629_v13, %v368_v14 }
 0x118   : > { %v664_v16 = vpop.f32.mrf.mxu0 }
 0x119   : > { %v374_v17 = vmax.f32 %v369_v15, 0.0 }
 0x11a   : > { %v371_v18 = vpop.f32.mrf.mxu0 }
 0x11b   : > { %v375_v19 = vpack.c.bf16 %v374_v17, %v374_v17 }
 0x11c   : > { %v665_v20 = vpop.f32.mrf.mxu0 }
 0x11d   : > { %683 = vmatmul.mubr.bf16.vlgmr.msra.gmra.mxu1 %v375_v19 }
 0x1dd   : > { %v481_v22 = vpop.f32.mrf.mxu1 }
 0x1de   : > { %v482_v23 = vadd.f32 %v633_v21, %v481_v22 }
 0x1df   : > { %v684_v24 = vpop.f32.mrf.mxu1 }
 0x1e0   : > { %487 = vst [vmem:[%s300_s16] sm:$0xff] %v482_v23 }
 0x1e1   : > { %v484_v25 = vpop.f32.mrf.mxu1 }
 0x1e2   : > { %876 = shalt.err (!%p873_p5)
}
 0x1e3   : > { %s877_s1 = scalar_lea.hbm %s1135_s8, 128  ;;  %s881_s28 = scalar_lea.hbm %s1188_s5, 256 }
 0x1e4   : > { %p878_p10 = scmp.ne.s32.totalorder %s1135_s8, %s877_s1  ;;  %p882_p6 = scmp.lt.s32.totalorder %s1135_s8, %s1188_s5 }
 0x1e5   : > { %p883_p12 = scmp.lt.s32.totalorder %s881_s28, %s877_s1 }
 0x1e6   : > { %p879_p1 = pnand %p878_p10, %p1082_p7 }
 0x1e7   : > { %p884_p3 = por %p883_p12, %p882_p6 }
 0x1e8   : > { %p880_p4 = pneg %p879_p1 }
 0x1ea   : > { %p885_p8 = pnand %p884_p3, %p880_p4 }
 0x1ec   : > { %888 = shalt.err (!%p885_p8)
}
 0x1ed   : > { %696 = dma.vmem_to_hbm [thread:$0]  (%p1082_p7), %s1137_s17, 128, %s1135_s8, %s489_s6   ;;  %v685_v26 = vpop.f32.mrf.mxu1 }
 0x1ee PF: > { %s515_s15 = sand.u32 1, %s927_s18   ;;  %p1204_p9 = scmp.ne.s32.totalorder %s1196_s29, 0 }
 0x1ef   : > { %p1205_p11 = scmp.ge.s32.totalorder %s947_s23, 2  ;;  %s516_s16 = scalar_lea.sflag [#allocation4], %s515_s15 }
 0x1f1   : > { %p710_p2 = pnand %p1205_p11, %p1204_p9 }
 0x1f3   : > { %p711_p13 = pneg %p710_p2 }
 0x1f5   : > { %922 = dma.done.wait (%p711_p13), %s516_s16, 128  }
 0x1f6   : > { %924 = vsyncadd (%p711_p13), %s516_s16, 4294967168  ;;  %s22_s23 = sadd.s32 1, %s947_s23   ;;  %s1206_s18 = smov %s931_s19 }
 0x1f7   : > { %p19_p0 = scmp.ge.s32.totalorder %s22_s23, 4   ;;  %s1207_s19 = smov %s935_s20 }
 0x1f8   : > { %s1208_s20 = smov %s1091_s12  ;;  %s1209_s21 = smov %s943_s22 }
 0x1f9   : > { %s1210_s22 = smov %s1212_s25  ;;  %21 = sbr.rel (!%p19_p0) target bundleno = 9 (0x9), region = 97 }
 0x1fe   :  { %521 = vsyncpa [#allocation3], 1 }
 0x1ff   :  { %523 = vsyncpa [#allocation3 + $0x1], 1 }
 0x200   :  { %524 = vsyncpa [#allocation6], 1 }
 0x201   :  { %525 = vsyncpa [#allocation4], 1 }
 0x202   :  { %527 = vsyncpa [#allocation4 + $0x1], 1 }

</bundles_post_ra>
